<compile_context>
chip_gen: v5e
topology: v5e:2x2
jax: 0.10.0
libtpu: 0.0.40
codegen_flags: <defaults>
</compile_context>

<pallas_src>
import functools

import jax
import jax.numpy as jnp
from jax import lax
from jax.experimental import pallas as pl
from jax.experimental.pallas import tpu as pltpu


# --------------------------------------------------------------------------
# Fused kernel: embedding + mask + one transformer block, whole batch at once.
# --------------------------------------------------------------------------
def bert_fused_kernel(
    tok2d_ref, tokcol_ref, emb_ref, pe_ref,
    wqkv_ref, bqkv_ref, wo_ref, bo_ref,
    ln1_g_ref, ln1_b_ref,
    w1_ref, b1_ref, w2_ref, b2_ref,
    ln2_g_ref, ln2_b_ref,
    o_ref,
    *, n_heads: int, batch: int, seqlen: int,
):
    BS = batch * seqlen
    Vp, H = emb_ref.shape
    dh = H // n_heads
    f32 = jnp.float32
    bf16 = jnp.bfloat16
    eps = f32(1e-6)

    # ---- NLPEmbedding: one-hot gather on the MXU + positional encoding ----
    # (padding_idx=0 row of the table is zero, so pads embed to 0 exactly).
    onehot = (tokcol_ref[...] ==
              lax.broadcasted_iota(jnp.int32, (BS, Vp), 1)).astype(f32)
    x = jnp.dot(onehot, emb_ref[...], preferred_element_type=f32) + pe_ref[...]
    # TODO(synk): dropout is identity (eval-mode forward; no RNG dropout here).

    def layer_norm(v, g, b):
        mean = jnp.mean(v, axis=-1, keepdims=True)
        # torch.std default = unbiased estimator (divides by H-1)
        var = jnp.sum((v - mean) ** 2, axis=-1, keepdims=True) * f32(1.0 / (H - 1))
        inv = pl.reciprocal(jnp.sqrt(var) + eps, approx=True)   # EUP slot
        return g * (v - mean) * inv + b

    # ---- multi-head attention sublayer (pre-LN, residual) ----
    y_bf = layer_norm(x, ln1_g_ref[...], ln1_b_ref[...]).astype(bf16)  # cast once
    qkv = jnp.dot(y_bf, wqkv_ref[...], preferred_element_type=f32) + bqkv_ref[...]

    def heads_to_batch(col0):
        # (BS, dh) per-head lane slices -> (B, S, dh), stacked head-major on
        # axis 0 (cheap leading-axis concat) so both attention einsums run
        # once, batched over n_heads*B, instead of per head.
        return jnp.concatenate(
            [qkv[:, col0 + h * dh: col0 + (h + 1) * dh].reshape(batch, seqlen, dh)
             for h in range(n_heads)], axis=0).astype(bf16)

    qh = heads_to_batch(0)        # (nh*B, S, dh); 1/sqrt(dh) pre-folded into wq/bq
    kh = heads_to_batch(H)
    vh = heads_to_batch(2 * H)

    # Key-padding mask from raw tokens, hoisted once (masked_fill(-1e9) semantics).
    maskf = (tok2d_ref[...] != 0).astype(f32)[:, None, :]              # (B, 1, S)
    keep = jnp.concatenate([maskf] * n_heads, axis=0) != 0.0           # (nh*B, 1, S)

    s = jnp.einsum('bqd,bkd->bqk', qh, kh, preferred_element_type=f32)  # (nh*B,S,S)
    s = jnp.where(keep, s, f32(-1e9))
    s = s - jnp.max(s, axis=-1, keepdims=True)
    p = jnp.exp(s)
    p = p * pl.reciprocal(jnp.sum(p, axis=-1, keepdims=True), approx=True)
    ctx_bh = jnp.einsum('bqk,bkd->bqd', p.astype(bf16), vh,
                        preferred_element_type=f32)                     # (nh*B,S,dh)

    ctx = jnp.concatenate(
        [ctx_bh[h * batch:(h + 1) * batch].reshape(BS, dh) for h in range(n_heads)],
        axis=-1)                                                        # (BS, H)
    attn_out = jnp.dot(ctx.astype(bf16), wo_ref[...],
                       preferred_element_type=f32) + bo_ref[...]
    x1 = x + attn_out                                 # dropout = identity (eval)

    # ---- position-wise feed-forward sublayer (pre-LN, residual) ----
    y2_bf = layer_norm(x1, ln2_g_ref[...], ln2_b_ref[...]).astype(bf16)
    h1 = jnp.dot(y2_bf, w1_ref[...], preferred_element_type=f32) + b1_ref[...]
    # GELU, tanh approximation; cube via two VPU multiplies, tanh on the EUP.
    h1 = 0.5 * h1 * (1.0 + jnp.tanh(0.7978845608028654 *
                                    (h1 + 0.044715 * (h1 * h1 * h1))))
    ff = jnp.dot(h1.astype(bf16), w2_ref[...], preferred_element_type=f32) + b2_ref[...]
    x2 = x1 + ff                                      # dropout = identity (eval)

    o_ref[...] = x2.astype(o_ref.dtype)


# --------------------------------------------------------------------------
# Wrapper: whole BERT forward = one pallas_call (jit this function).
# --------------------------------------------------------------------------
def bert_forward(tokens, emb_table_padded, pe, p, *, n_heads):
    B, S = tokens.shape
    Vp, H = emb_table_padded.shape
    BS = B * S
    FF = p["w1"].shape[1]

    tok2d = tokens.astype(jnp.int32)                       # (B, S)   -> mask
    tokcol = tok2d.reshape(BS, 1)                          # (BS, 1)  -> gather
    pe_flat = jnp.broadcast_to(pe[None, :S, :], (B, S, H)).reshape(BS, H)

    def const_spec(shape):  # full-array block, constant index map
        return pl.BlockSpec(shape, lambda i, _n=len(shape): (0,) * _n)

    in_specs = [
        const_spec((B, S)),                        # tokens (mask)
        const_spec((BS, 1)),                       # tokens (one-hot gather)
        const_spec((Vp, H)),                       # embedding table (f32)
        const_spec((BS, H)),                       # positional encoding (tiled)
        const_spec((H, 3 * H)), const_spec((1, 3 * H)),   # fused wqkv / bqkv
        const_spec((H, H)), const_spec((1, H)),    # wo, bo
        const_spec((1, H)), const_spec((1, H)),    # ln1 gamma, beta
        const_spec((H, FF)), const_spec((1, FF)),  # w1, b1
        const_spec((FF, H)), const_spec((1, H)),   # w2, b2
        const_spec((1, H)), const_spec((1, H)),    # ln2 gamma, beta
    ]
    out_spec = const_spec((BS, H))
    # NOTE(scaling): at real BERT sizes add a "parallel" row-tile grid axis
    # (v7x megacore), single-buffer the weight specs / tile FF, and raise
    # vmem_limit_bytes; H=768 makes the output lane-dense automatically.

    flops = (2 * BS * Vp * H            # embedding one-hot gather
             + 2 * BS * H * 3 * H       # fused QKV projection
             + 4 * B * S * S * H        # attention scores + context
             + 2 * BS * H * H           # output projection
             + 4 * BS * H * FF)         # feed-forward
    transcendentals = n_heads * B * S * S + BS * FF + 4 * BS
    bytes_accessed = (tok2d.size * 4 + tokcol.size * 4 + Vp * H * 4 + BS * H * 4
                      + (3 * H * H + H * H + 2 * H * FF) * 2
                      + (3 * H + 5 * H + FF) * 4 + BS * H * 4)
    cost = pl.CostEstimate(flops=flops, transcendentals=transcendentals,
                           bytes_accessed=bytes_accessed)

    out_flat = pl.pallas_call(
        functools.partial(bert_fused_kernel, n_heads=n_heads, batch=B, seqlen=S),
        out_shape=jax.ShapeDtypeStruct((BS, H), jnp.float32),
        grid=(1,),
        in_specs=in_specs,
        out_specs=out_spec,
        compiler_params=pltpu.CompilerParams(dimension_semantics=("arbitrary",)),
        cost_estimate=cost,
    )(
        tok2d, tokcol, emb_table_padded, pe_flat,
        p["w_qkv"], p["b_qkv"], p["wo"], p["bo"],
        p["ln1_g"], p["ln1_b"],
        p["w1"], p["b1"], p["w2"], p["b2"],
        p["ln2_g"], p["ln2_b"],
    )
    return out_flat.reshape(B, S, H)


# --------------------------------------------------------------------------
# Parameters: raw (PyTorch-like) construction + one-time packing to bf16.
# --------------------------------------------------------------------------
def sinusoidal_pe(max_len, d):
    pos = jnp.arange(max_len, dtype=jnp.float32)[:, None]
    idx = jnp.arange(0, d, 2, dtype=jnp.float32)
    div = jnp.exp(-jnp.log(jnp.float32(10000.0)) * idx / jnp.float32(d))
    pe = jnp.zeros((max_len, d), jnp.float32)
    pe = pe.at[:, 0::2].set(jnp.sin(pos * div))
    pe = pe.at[:, 1::2].set(jnp.cos(pos * div))
    return pe


def make_block_params(key, hidden, ff):
    keys = jax.random.split(key, 6)
    n = lambda k, shp: jax.random.normal(k, shp, jnp.float32) * 0.02
    z = lambda d: jnp.zeros((1, d), jnp.float32)
    return {
        "wq": n(keys[0], (hidden, hidden)), "bq": z(hidden),
        "wk": n(keys[1], (hidden, hidden)), "bk": z(hidden),
        "wv": n(keys[2], (hidden, hidden)), "bv": z(hidden),
        "wo": n(keys[3], (hidden, hidden)), "bo": z(hidden),
        "ln1_g": jnp.ones((1, hidden), jnp.float32), "ln1_b": z(hidden),
        "w1": n(keys[4], (hidden, ff)), "b1": z(ff),
        "w2": n(keys[5], (ff, hidden)), "b2": z(hidden),
        "ln2_g": jnp.ones((1, hidden), jnp.float32), "ln2_b": z(hidden),
    }


def prepare_block_params(p, n_heads):
    """One-time packing: fuse QKV, fold 1/sqrt(dh) into q, cast weights to bf16."""
    H = p["wq"].shape[0]
    dh = H // n_heads
    scale = jnp.float32(1.0 / (dh ** 0.5))
    bf = lambda w: w.astype(jnp.bfloat16)
    return {
        "w_qkv": bf(jnp.concatenate([p["wq"] * scale, p["wk"], p["wv"]], axis=1)),
        "b_qkv": jnp.concatenate([p["bq"] * scale, p["bk"], p["bv"]], axis=1),
        "wo": bf(p["wo"]), "bo": p["bo"],
        "ln1_g": p["ln1_g"], "ln1_b": p["ln1_b"],
        "w1": bf(p["w1"]), "b1": p["b1"],
        "w2": bf(p["w2"]), "b2": p["b2"],
        "ln2_g": p["ln2_g"], "ln2_b": p["ln2_b"],
    }


if __name__ == "__main__":
    # BERT hyperparameters (small, consistent with the module's __init__)
    embedding_dim = 32          # hidden
    max_len = 8                 # sequence length
    n_transformer_layers = 2
    attn_heads = 4
    feed_forward_hidden = embedding_dim * 4
    vocab_size = 30             # token ids; 0 = <pad>
    batch = 2

    key = jax.random.PRNGKey(0)
    k_tok, k_emb, k_blk = jax.random.split(key, 3)

    # deterministic token ids with some padding to exercise the mask
    tokens = jax.random.randint(k_tok, (batch, max_len), 1, vocab_size, jnp.int32)
    tokens = tokens.at[0, 6:].set(0)

    # token embedding table (padding_idx=0 -> zero row), padded to a multiple
    # of 8 rows for a tile-friendly one-hot gather inside the kernel
    emb_table = jax.random.normal(k_emb, (vocab_size, embedding_dim), jnp.float32) * 0.02
    emb_table = emb_table.at[0].set(0.0)
    v_pad = ((vocab_size + 7) // 8) * 8
    emb_padded = jnp.zeros((v_pad, embedding_dim), jnp.float32).at[:vocab_size].set(emb_table)

    pe = sinusoidal_pe(max_len, embedding_dim)

    # all transformer blocks are deep copies of one module -> identical params
    shared_block = make_block_params(k_blk, embedding_dim, feed_forward_hidden)
    block_params_list = [shared_block for _ in range(n_transformer_layers)]

    # BERT.forward applies every block to `embedded_seqs` and overwrites x, so
    # only the LAST block's output is live — compute exactly that block.
    prepared = prepare_block_params(block_params_list[-1], attn_heads)

    fwd = jax.jit(functools.partial(bert_forward, n_heads=attn_heads))
    out = jax.block_until_ready(fwd(tokens, emb_padded, pe, prepared))

    assert out.shape == (batch, max_len, embedding_dim)
    assert bool(jnp.all(jnp.isfinite(out)))
    print("KERNEL_OK")
</pallas_src>

<mosaic_0001>
module attributes {stable_mosaic.version = 11 : i64} {
  func.func @bert_fused_kernel(%arg0: i32, %arg1: memref<2x8xi32, #tpu.memory_space<vmem>>, %arg2: memref<16x1xi32, #tpu.memory_space<vmem>>, %arg3: memref<32x32xf32, #tpu.memory_space<vmem>>, %arg4: memref<16x32xf32, #tpu.memory_space<vmem>>, %arg5: memref<32x96xbf16, #tpu.memory_space<vmem>>, %arg6: memref<1x96xf32, #tpu.memory_space<vmem>>, %arg7: memref<32x32xbf16, #tpu.memory_space<vmem>>, %arg8: memref<1x32xf32, #tpu.memory_space<vmem>>, %arg9: memref<1x32xf32, #tpu.memory_space<vmem>>, %arg10: memref<1x32xf32, #tpu.memory_space<vmem>>, %arg11: memref<32x128xbf16, #tpu.memory_space<vmem>>, %arg12: memref<1x128xf32, #tpu.memory_space<vmem>>, %arg13: memref<128x32xbf16, #tpu.memory_space<vmem>>, %arg14: memref<1x32xf32, #tpu.memory_space<vmem>>, %arg15: memref<1x32xf32, #tpu.memory_space<vmem>>, %arg16: memref<1x32xf32, #tpu.memory_space<vmem>>, %arg17: memref<16x32xf32, #tpu.memory_space<vmem>>) attributes {dimension_semantics = [#tpu.dimension_semantics<arbitrary>], iteration_bounds = array<i64: 1>, scalar_prefetch = 0 : i64, scratch_operands = 0 : i64, tpu.core_type = #tpu.core_type<tc>, window_params = [{pipeline_mode = #tpu.pipeline_mode<synchronous>, transform_indices = @transform_0, window_bounds = array<i64: 2, 8>}, {pipeline_mode = #tpu.pipeline_mode<synchronous>, transform_indices = @transform_1, window_bounds = array<i64: 16, 1>}, {pipeline_mode = #tpu.pipeline_mode<synchronous>, transform_indices = @transform_2, window_bounds = array<i64: 32, 32>}, {pipeline_mode = #tpu.pipeline_mode<synchronous>, transform_indices = @transform_3, window_bounds = array<i64: 16, 32>}, {pipeline_mode = #tpu.pipeline_mode<synchronous>, transform_indices = @transform_4, window_bounds = array<i64: 32, 96>}, {pipeline_mode = #tpu.pipeline_mode<synchronous>, transform_indices = @transform_5, window_bounds = array<i64: 1, 96>}, {pipeline_mode = #tpu.pipeline_mode<synchronous>, transform_indices = @transform_6, window_bounds = array<i64: 32, 32>}, {pipeline_mode = #tpu.pipeline_mode<synchronous>, transform_indices = @transform_7, window_bounds = array<i64: 1, 32>}, {pipeline_mode = #tpu.pipeline_mode<synchronous>, transform_indices = @transform_8, window_bounds = array<i64: 1, 32>}, {pipeline_mode = #tpu.pipeline_mode<synchronous>, transform_indices = @transform_9, window_bounds = array<i64: 1, 32>}, {pipeline_mode = #tpu.pipeline_mode<synchronous>, transform_indices = @transform_10, window_bounds = array<i64: 32, 128>}, {pipeline_mode = #tpu.pipeline_mode<synchronous>, transform_indices = @transform_11, window_bounds = array<i64: 1, 128>}, {pipeline_mode = #tpu.pipeline_mode<synchronous>, transform_indices = @transform_12, window_bounds = array<i64: 128, 32>}, {pipeline_mode = #tpu.pipeline_mode<synchronous>, transform_indices = @transform_13, window_bounds = array<i64: 1, 32>}, {pipeline_mode = #tpu.pipeline_mode<synchronous>, transform_indices = @transform_14, window_bounds = array<i64: 1, 32>}, {pipeline_mode = #tpu.pipeline_mode<synchronous>, transform_indices = @transform_15, window_bounds = array<i64: 1, 32>}, {pipeline_mode = #tpu.pipeline_mode<synchronous>, transform_indices = @transform_16, window_bounds = array<i64: 16, 32>}]} {
    %c0 = arith.constant 0 : index
    %c0_0 = arith.constant 0 : index
    %0 = vector.load %arg2[%c0, %c0_0] : memref<16x1xi32, #tpu.memory_space<vmem>>, vector<16x1xi32>
    %1 = tpu.iota {dimensions = array<i32: 1>} : vector<16x32xi32>
    %2 = vector.broadcast %0 : vector<16x1xi32> to vector<16x32xi32>
    %3 = arith.cmpi eq, %2, %1 : vector<16x32xi32>
    %4 = arith.extui %3 : vector<16x32xi1> to vector<16x32xi32>
    %5 = arith.sitofp %4 : vector<16x32xi32> to vector<16x32xf32>
    %c0_1 = arith.constant 0 : index
    %c0_2 = arith.constant 0 : index
    %6 = vector.load %arg3[%c0_1, %c0_2] : memref<32x32xf32, #tpu.memory_space<vmem>>, vector<32x32xf32>
    %cst = arith.constant dense<0.000000e+00> : vector<16x32xf32>
    %7 = tpu.matmul %5, %6, %cst {dimension_numbers = #tpu.dot_dimension_numbers<[1], [0], [0], [1], [0, 0, 1, 1], [], []>} : vector<16x32xf32>, vector<32x32xf32>, vector<16x32xf32> -> vector<16x32xf32>
    %c0_3 = arith.constant 0 : index
    %c0_4 = arith.constant 0 : index
    %8 = vector.load %arg4[%c0_3, %c0_4] : memref<16x32xf32, #tpu.memory_space<vmem>>, vector<16x32xf32>
    %9 = arith.addf %7, %8 : vector<16x32xf32>
    %c0_5 = arith.constant 0 : index
    %c0_6 = arith.constant 0 : index
    %10 = vector.load %arg9[%c0_5, %c0_6] : memref<1x32xf32, #tpu.memory_space<vmem>>, vector<1x32xf32>
    %c0_7 = arith.constant 0 : index
    %c0_8 = arith.constant 0 : index
    %11 = vector.load %arg10[%c0_7, %c0_8] : memref<1x32xf32, #tpu.memory_space<vmem>>, vector<1x32xf32>
    %cst_9 = arith.constant dense<0.000000e+00> : vector<16xf32>
    %12 = vector.multi_reduction <add>, %9, %cst_9 [1] : vector<16x32xf32> to vector<16xf32>
    %13 = vector.shape_cast %12 : vector<16xf32> to vector<16x1xf32>
    %cst_10 = arith.constant 3.200000e+01 : f32
    %14 = vector.broadcast %cst_10 : f32 to vector<16x1xf32>
    %15 = arith.divf %13, %14 : vector<16x1xf32>
    %16 = vector.broadcast %15 : vector<16x1xf32> to vector<16x32xf32>
    %17 = arith.subf %9, %16 : vector<16x32xf32>
    %18 = arith.mulf %17, %17 : vector<16x32xf32>
    %cst_11 = arith.constant dense<0.000000e+00> : vector<16xf32>
    %19 = vector.multi_reduction <add>, %18, %cst_11 [1] : vector<16x32xf32> to vector<16xf32>
    %20 = vector.shape_cast %19 : vector<16xf32> to vector<16x1xf32>
    %cst_12 = arith.constant 0.0322580636 : f32
    %21 = vector.broadcast %cst_12 : f32 to vector<16x1xf32>
    %22 = arith.mulf %20, %21 : vector<16x1xf32>
    %23 = math.sqrt %22 : vector<16x1xf32>
    %cst_13 = arith.constant 9.99999997E-7 : f32
    %24 = vector.broadcast %cst_13 : f32 to vector<16x1xf32>
    %25 = arith.addf %23, %24 : vector<16x1xf32>
    %26 = tpu.reciprocal %25 {approx = true} : vector<16x1xf32> -> vector<16x1xf32>
    %27 = vector.broadcast %15 : vector<16x1xf32> to vector<16x32xf32>
    %28 = arith.subf %9, %27 : vector<16x32xf32>
    %29 = vector.broadcast %10 : vector<1x32xf32> to vector<16x32xf32>
    %30 = arith.mulf %29, %28 : vector<16x32xf32>
    %31 = vector.broadcast %26 : vector<16x1xf32> to vector<16x32xf32>
    %32 = arith.mulf %30, %31 : vector<16x32xf32>
    %33 = vector.broadcast %11 : vector<1x32xf32> to vector<16x32xf32>
    %34 = arith.addf %32, %33 : vector<16x32xf32>
    %35 = arith.truncf %34 : vector<16x32xf32> to vector<16x32xbf16>
    %c0_14 = arith.constant 0 : index
    %c0_15 = arith.constant 0 : index
    %36 = vector.load %arg5[%c0_14, %c0_15] : memref<32x96xbf16, #tpu.memory_space<vmem>>, vector<32x96xbf16>
    %cst_16 = arith.constant dense<0.000000e+00> : vector<16x96xf32>
    %37 = tpu.matmul %35, %36, %cst_16 {dimension_numbers = #tpu.dot_dimension_numbers<[1], [0], [0], [1], [0, 0, 1, 1], [], []>} : vector<16x32xbf16>, vector<32x96xbf16>, vector<16x96xf32> -> vector<16x96xf32>
    %c0_17 = arith.constant 0 : index
    %c0_18 = arith.constant 0 : index
    %38 = vector.load %arg6[%c0_17, %c0_18] : memref<1x96xf32, #tpu.memory_space<vmem>>, vector<1x96xf32>
    %39 = vector.broadcast %38 : vector<1x96xf32> to vector<16x96xf32>
    %40 = arith.addf %37, %39 : vector<16x96xf32>
    %41 = vector.extract_strided_slice %40 {offsets = [0, 0], sizes = [16, 8], strides = [1, 1]} : vector<16x96xf32> to vector<16x8xf32>
    %42 = vector.shape_cast %41 : vector<16x8xf32> to vector<2x8x8xf32>
    %43 = vector.extract_strided_slice %40 {offsets = [0, 8], sizes = [16, 8], strides = [1, 1]} : vector<16x96xf32> to vector<16x8xf32>
    %44 = vector.shape_cast %43 : vector<16x8xf32> to vector<2x8x8xf32>
    %45 = vector.extract_strided_slice %40 {offsets = [0, 16], sizes = [16, 8], strides = [1, 1]} : vector<16x96xf32> to vector<16x8xf32>
    %46 = vector.shape_cast %45 : vector<16x8xf32> to vector<2x8x8xf32>
    %47 = vector.extract_strided_slice %40 {offsets = [0, 24], sizes = [16, 8], strides = [1, 1]} : vector<16x96xf32> to vector<16x8xf32>
    %48 = vector.shape_cast %47 : vector<16x8xf32> to vector<2x8x8xf32>
    %49 = tpu.concatenate %42, %44, %46, %48 in 0 : vector<2x8x8xf32>, vector<2x8x8xf32>, vector<2x8x8xf32>, vector<2x8x8xf32> -> vector<8x8x8xf32>
    %50 = arith.truncf %49 : vector<8x8x8xf32> to vector<8x8x8xbf16>
    %51 = vector.extract_strided_slice %40 {offsets = [0, 32], sizes = [16, 8], strides = [1, 1]} : vector<16x96xf32> to vector<16x8xf32>
    %52 = vector.shape_cast %51 : vector<16x8xf32> to vector<2x8x8xf32>
    %53 = vector.extract_strided_slice %40 {offsets = [0, 40], sizes = [16, 8], strides = [1, 1]} : vector<16x96xf32> to vector<16x8xf32>
    %54 = vector.shape_cast %53 : vector<16x8xf32> to vector<2x8x8xf32>
    %55 = vector.extract_strided_slice %40 {offsets = [0, 48], sizes = [16, 8], strides = [1, 1]} : vector<16x96xf32> to vector<16x8xf32>
    %56 = vector.shape_cast %55 : vector<16x8xf32> to vector<2x8x8xf32>
    %57 = vector.extract_strided_slice %40 {offsets = [0, 56], sizes = [16, 8], strides = [1, 1]} : vector<16x96xf32> to vector<16x8xf32>
    %58 = vector.shape_cast %57 : vector<16x8xf32> to vector<2x8x8xf32>
    %59 = tpu.concatenate %52, %54, %56, %58 in 0 : vector<2x8x8xf32>, vector<2x8x8xf32>, vector<2x8x8xf32>, vector<2x8x8xf32> -> vector<8x8x8xf32>
    %60 = arith.truncf %59 : vector<8x8x8xf32> to vector<8x8x8xbf16>
    %61 = vector.extract_strided_slice %40 {offsets = [0, 64], sizes = [16, 8], strides = [1, 1]} : vector<16x96xf32> to vector<16x8xf32>
    %62 = vector.shape_cast %61 : vector<16x8xf32> to vector<2x8x8xf32>
    %63 = vector.extract_strided_slice %40 {offsets = [0, 72], sizes = [16, 8], strides = [1, 1]} : vector<16x96xf32> to vector<16x8xf32>
    %64 = vector.shape_cast %63 : vector<16x8xf32> to vector<2x8x8xf32>
    %65 = vector.extract_strided_slice %40 {offsets = [0, 80], sizes = [16, 8], strides = [1, 1]} : vector<16x96xf32> to vector<16x8xf32>
    %66 = vector.shape_cast %65 : vector<16x8xf32> to vector<2x8x8xf32>
    %67 = vector.extract_strided_slice %40 {offsets = [0, 88], sizes = [16, 8], strides = [1, 1]} : vector<16x96xf32> to vector<16x8xf32>
    %68 = vector.shape_cast %67 : vector<16x8xf32> to vector<2x8x8xf32>
    %69 = tpu.concatenate %62, %64, %66, %68 in 0 : vector<2x8x8xf32>, vector<2x8x8xf32>, vector<2x8x8xf32>, vector<2x8x8xf32> -> vector<8x8x8xf32>
    %70 = arith.truncf %69 : vector<8x8x8xf32> to vector<8x8x8xbf16>
    %c0_19 = arith.constant 0 : index
    %c0_20 = arith.constant 0 : index
    %71 = vector.load %arg1[%c0_19, %c0_20] : memref<2x8xi32, #tpu.memory_space<vmem>>, vector<2x8xi32>
    %c0_i32 = arith.constant 0 : i32
    %72 = vector.broadcast %c0_i32 : i32 to vector<2x8xi32>
    %73 = arith.cmpi ne, %71, %72 : vector<2x8xi32>
    %74 = arith.extui %73 : vector<2x8xi1> to vector<2x8xi32>
    %75 = arith.sitofp %74 : vector<2x8xi32> to vector<2x8xf32>
    %76 = vector.shape_cast %75 : vector<2x8xf32> to vector<2x1x8xf32>
    %77 = tpu.concatenate %76, %76, %76, %76 in 0 : vector<2x1x8xf32>, vector<2x1x8xf32>, vector<2x1x8xf32>, vector<2x1x8xf32> -> vector<8x1x8xf32>
    %cst_21 = arith.constant 0.000000e+00 : f32
    %78 = vector.broadcast %cst_21 : f32 to vector<8x1x8xf32>
    %79 = arith.cmpf one, %77, %78 : vector<8x1x8xf32>
    "tpu.trace_start"() <{level = 10 : i32, message = "bqd,bkd->bqk"}> : () -> ()
    %cst_22 = arith.constant dense<0.000000e+00> : vector<8x8x8xf32>
    %80 = tpu.matmul %50, %60, %cst_22 {dimension_numbers = #tpu.dot_dimension_numbers<[2], [2], [1], [1], [0, 0, 0, 1, 1, 1], [0], [0]>} : vector<8x8x8xbf16>, vector<8x8x8xbf16>, vector<8x8x8xf32> -> vector<8x8x8xf32>
    %cst_23 = arith.constant -1.000000e+09 : f32
    "tpu.trace_stop"() : () -> ()
    %81 = vector.shape_cast %79 : vector<8x1x8xi1> to vector<8x1x8xi1>
    %82 = vector.broadcast %81 : vector<8x1x8xi1> to vector<8x8x8xi1>
    %83 = vector.broadcast %cst_23 : f32 to vector<8x8x8xf32>
    %84 = arith.select %82, %80, %83 : vector<8x8x8xi1>, vector<8x8x8xf32>
    %cst_24 = arith.constant dense<0xFF800000> : vector<8x8xf32>
    %85 = vector.multi_reduction <maximumf>, %84, %cst_24 [2] : vector<8x8x8xf32> to vector<8x8xf32>
    %86 = vector.shape_cast %85 : vector<8x8xf32> to vector<8x8x1xf32>
    %87 = vector.broadcast %86 : vector<8x8x1xf32> to vector<8x8x8xf32>
    %88 = arith.subf %84, %87 : vector<8x8x8xf32>
    %89 = math.exp %88 : vector<8x8x8xf32>
    %cst_25 = arith.constant dense<0.000000e+00> : vector<8x8xf32>
    %90 = vector.multi_reduction <add>, %89, %cst_25 [2] : vector<8x8x8xf32> to vector<8x8xf32>
    %91 = vector.shape_cast %90 : vector<8x8xf32> to vector<8x8x1xf32>
    %92 = tpu.reciprocal %91 {approx = true} : vector<8x8x1xf32> -> vector<8x8x1xf32>
    %93 = vector.broadcast %92 : vector<8x8x1xf32> to vector<8x8x8xf32>
    %94 = arith.mulf %89, %93 : vector<8x8x8xf32>
    %95 = arith.truncf %94 : vector<8x8x8xf32> to vector<8x8x8xbf16>
    "tpu.trace_start"() <{level = 10 : i32, message = "bqk,bkd->bqd"}> : () -> ()
    %cst_26 = arith.constant dense<0.000000e+00> : vector<8x8x8xf32>
    %96 = tpu.matmul %95, %70, %cst_26 {dimension_numbers = #tpu.dot_dimension_numbers<[2], [1], [1], [2], [0, 0, 0, 1, 1, 2], [0], [0]>} : vector<8x8x8xbf16>, vector<8x8x8xbf16>, vector<8x8x8xf32> -> vector<8x8x8xf32>
    "tpu.trace_stop"() : () -> ()
    %97 = vector.extract_strided_slice %96 {offsets = [0, 0, 0], sizes = [2, 8, 8], strides = [1, 1, 1]} : vector<8x8x8xf32> to vector<2x8x8xf32>
    %98 = vector.shape_cast %97 : vector<2x8x8xf32> to vector<16x8xf32>
    %99 = vector.extract_strided_slice %96 {offsets = [2, 0, 0], sizes = [2, 8, 8], strides = [1, 1, 1]} : vector<8x8x8xf32> to vector<2x8x8xf32>
    %100 = vector.shape_cast %99 : vector<2x8x8xf32> to vector<16x8xf32>
    %101 = vector.extract_strided_slice %96 {offsets = [4, 0, 0], sizes = [2, 8, 8], strides = [1, 1, 1]} : vector<8x8x8xf32> to vector<2x8x8xf32>
    %102 = vector.shape_cast %101 : vector<2x8x8xf32> to vector<16x8xf32>
    %103 = vector.extract_strided_slice %96 {offsets = [6, 0, 0], sizes = [2, 8, 8], strides = [1, 1, 1]} : vector<8x8x8xf32> to vector<2x8x8xf32>
    %104 = vector.shape_cast %103 : vector<2x8x8xf32> to vector<16x8xf32>
    %105 = tpu.concatenate %98, %100, %102, %104 in 1 : vector<16x8xf32>, vector<16x8xf32>, vector<16x8xf32>, vector<16x8xf32> -> vector<16x32xf32>
    %106 = arith.truncf %105 : vector<16x32xf32> to vector<16x32xbf16>
    %c0_27 = arith.constant 0 : index
    %c0_28 = arith.constant 0 : index
    %107 = vector.load %arg7[%c0_27, %c0_28] : memref<32x32xbf16, #tpu.memory_space<vmem>>, vector<32x32xbf16>
    %cst_29 = arith.constant dense<0.000000e+00> : vector<16x32xf32>
    %108 = tpu.matmul %106, %107, %cst_29 {dimension_numbers = #tpu.dot_dimension_numbers<[1], [0], [0], [1], [0, 0, 1, 1], [], []>} : vector<16x32xbf16>, vector<32x32xbf16>, vector<16x32xf32> -> vector<16x32xf32>
    %c0_30 = arith.constant 0 : index
    %c0_31 = arith.constant 0 : index
    %109 = vector.load %arg8[%c0_30, %c0_31] : memref<1x32xf32, #tpu.memory_space<vmem>>, vector<1x32xf32>
    %110 = vector.broadcast %109 : vector<1x32xf32> to vector<16x32xf32>
    %111 = arith.addf %108, %110 : vector<16x32xf32>
    %112 = arith.addf %9, %111 : vector<16x32xf32>
    %c0_32 = arith.constant 0 : index
    %c0_33 = arith.constant 0 : index
    %113 = vector.load %arg15[%c0_32, %c0_33] : memref<1x32xf32, #tpu.memory_space<vmem>>, vector<1x32xf32>
    %c0_34 = arith.constant 0 : index
    %c0_35 = arith.constant 0 : index
    %114 = vector.load %arg16[%c0_34, %c0_35] : memref<1x32xf32, #tpu.memory_space<vmem>>, vector<1x32xf32>
    %cst_36 = arith.constant dense<0.000000e+00> : vector<16xf32>
    %115 = vector.multi_reduction <add>, %112, %cst_36 [1] : vector<16x32xf32> to vector<16xf32>
    %116 = vector.shape_cast %115 : vector<16xf32> to vector<16x1xf32>
    %cst_37 = arith.constant 3.200000e+01 : f32
    %117 = vector.broadcast %cst_37 : f32 to vector<16x1xf32>
    %118 = arith.divf %116, %117 : vector<16x1xf32>
    %119 = vector.broadcast %118 : vector<16x1xf32> to vector<16x32xf32>
    %120 = arith.subf %112, %119 : vector<16x32xf32>
    %121 = arith.mulf %120, %120 : vector<16x32xf32>
    %cst_38 = arith.constant dense<0.000000e+00> : vector<16xf32>
    %122 = vector.multi_reduction <add>, %121, %cst_38 [1] : vector<16x32xf32> to vector<16xf32>
    %123 = vector.shape_cast %122 : vector<16xf32> to vector<16x1xf32>
    %cst_39 = arith.constant 0.0322580636 : f32
    %124 = vector.broadcast %cst_39 : f32 to vector<16x1xf32>
    %125 = arith.mulf %123, %124 : vector<16x1xf32>
    %126 = math.sqrt %125 : vector<16x1xf32>
    %cst_40 = arith.constant 9.99999997E-7 : f32
    %127 = vector.broadcast %cst_40 : f32 to vector<16x1xf32>
    %128 = arith.addf %126, %127 : vector<16x1xf32>
    %129 = tpu.reciprocal %128 {approx = true} : vector<16x1xf32> -> vector<16x1xf32>
    %130 = vector.broadcast %118 : vector<16x1xf32> to vector<16x32xf32>
    %131 = arith.subf %112, %130 : vector<16x32xf32>
    %132 = vector.broadcast %113 : vector<1x32xf32> to vector<16x32xf32>
    %133 = arith.mulf %132, %131 : vector<16x32xf32>
    %134 = vector.broadcast %129 : vector<16x1xf32> to vector<16x32xf32>
    %135 = arith.mulf %133, %134 : vector<16x32xf32>
    %136 = vector.broadcast %114 : vector<1x32xf32> to vector<16x32xf32>
    %137 = arith.addf %135, %136 : vector<16x32xf32>
    %138 = arith.truncf %137 : vector<16x32xf32> to vector<16x32xbf16>
    %c0_41 = arith.constant 0 : index
    %c0_42 = arith.constant 0 : index
    %139 = vector.load %arg11[%c0_41, %c0_42] : memref<32x128xbf16, #tpu.memory_space<vmem>>, vector<32x128xbf16>
    %cst_43 = arith.constant dense<0.000000e+00> : vector<16x128xf32>
    %140 = tpu.matmul %138, %139, %cst_43 {dimension_numbers = #tpu.dot_dimension_numbers<[1], [0], [0], [1], [0, 0, 1, 1], [], []>} : vector<16x32xbf16>, vector<32x128xbf16>, vector<16x128xf32> -> vector<16x128xf32>
    %c0_44 = arith.constant 0 : index
    %c0_45 = arith.constant 0 : index
    %141 = vector.load %arg12[%c0_44, %c0_45] : memref<1x128xf32, #tpu.memory_space<vmem>>, vector<1x128xf32>
    %142 = vector.broadcast %141 : vector<1x128xf32> to vector<16x128xf32>
    %143 = arith.addf %140, %142 : vector<16x128xf32>
    %cst_46 = arith.constant 5.000000e-01 : f32
    %144 = vector.broadcast %cst_46 : f32 to vector<16x128xf32>
    %145 = arith.mulf %144, %143 : vector<16x128xf32>
    %146 = arith.mulf %143, %143 : vector<16x128xf32>
    %147 = arith.mulf %146, %143 : vector<16x128xf32>
    %cst_47 = arith.constant 4.471500e-02 : f32
    %148 = vector.broadcast %cst_47 : f32 to vector<16x128xf32>
    %149 = arith.mulf %148, %147 : vector<16x128xf32>
    %150 = arith.addf %143, %149 : vector<16x128xf32>
    %cst_48 = arith.constant 0.797884583 : f32
    %151 = vector.broadcast %cst_48 : f32 to vector<16x128xf32>
    %152 = arith.mulf %151, %150 : vector<16x128xf32>
    %153 = math.tanh %152 : vector<16x128xf32>
    %cst_49 = arith.constant 1.000000e+00 : f32
    %154 = vector.broadcast %cst_49 : f32 to vector<16x128xf32>
    %155 = arith.addf %154, %153 : vector<16x128xf32>
    %156 = arith.mulf %145, %155 : vector<16x128xf32>
    %157 = arith.truncf %156 : vector<16x128xf32> to vector<16x128xbf16>
    %c0_50 = arith.constant 0 : index
    %c0_51 = arith.constant 0 : index
    %158 = vector.load %arg13[%c0_50, %c0_51] : memref<128x32xbf16, #tpu.memory_space<vmem>>, vector<128x32xbf16>
    %cst_52 = arith.constant dense<0.000000e+00> : vector<16x32xf32>
    %159 = tpu.matmul %157, %158, %cst_52 {dimension_numbers = #tpu.dot_dimension_numbers<[1], [0], [0], [1], [0, 0, 1, 1], [], []>} : vector<16x128xbf16>, vector<128x32xbf16>, vector<16x32xf32> -> vector<16x32xf32>
    %c0_53 = arith.constant 0 : index
    %c0_54 = arith.constant 0 : index
    %160 = vector.load %arg14[%c0_53, %c0_54] : memref<1x32xf32, #tpu.memory_space<vmem>>, vector<1x32xf32>
    %161 = vector.broadcast %160 : vector<1x32xf32> to vector<16x32xf32>
    %162 = arith.addf %159, %161 : vector<16x32xf32>
    %163 = arith.addf %112, %162 : vector<16x32xf32>
    %c0_55 = arith.constant 0 : index
    %c0_56 = arith.constant 0 : index
    %164 = vector.load %arg17[%c0_55, %c0_56] : memref<16x32xf32, #tpu.memory_space<vmem>>, vector<16x32xf32>
    tpu.vector_store %arg17[%c0_55, %c0_56], %163 {strides = array<i32>} : memref<16x32xf32, #tpu.memory_space<vmem>>, vector<16x32xf32>,
    return
  }
  func.func @transform_0(%arg0: i32) -> (i32, i32) {
    %c0_i32 = arith.constant 0 : i32
    %c0_i32_0 = arith.constant 0 : i32
    %c0_i32_1 = arith.constant 0 : i32
    return %c0_i32, %c0_i32_0 : i32, i32
  }
  func.func @transform_1(%arg0: i32) -> (i32, i32) {
    %c0_i32 = arith.constant 0 : i32
    %c0_i32_0 = arith.constant 0 : i32
    %c0_i32_1 = arith.constant 0 : i32
    return %c0_i32, %c0_i32_0 : i32, i32
  }
  func.func @transform_2(%arg0: i32) -> (i32, i32) {
    %c0_i32 = arith.constant 0 : i32
    %c0_i32_0 = arith.constant 0 : i32
    %c0_i32_1 = arith.constant 0 : i32
    return %c0_i32, %c0_i32_0 : i32, i32
  }
  func.func @transform_3(%arg0: i32) -> (i32, i32) {
    %c0_i32 = arith.constant 0 : i32
    %c0_i32_0 = arith.constant 0 : i32
    %c0_i32_1 = arith.constant 0 : i32
    return %c0_i32, %c0_i32_0 : i32, i32
  }
  func.func @transform_4(%arg0: i32) -> (i32, i32) {
    %c0_i32 = arith.constant 0 : i32
    %c0_i32_0 = arith.constant 0 : i32
    %c0_i32_1 = arith.constant 0 : i32
    return %c0_i32, %c0_i32_0 : i32, i32
  }
  func.func @transform_5(%arg0: i32) -> (i32, i32) {
    %c0_i32 = arith.constant 0 : i32
    %c0_i32_0 = arith.constant 0 : i32
    %c0_i32_1 = arith.constant 0 : i32
    return %c0_i32, %c0_i32_0 : i32, i32
  }
  func.func @transform_6(%arg0: i32) -> (i32, i32) {
    %c0_i32 = arith.constant 0 : i32
    %c0_i32_0 = arith.constant 0 : i32
    %c0_i32_1 = arith.constant 0 : i32
    return %c0_i32, %c0_i32_0 : i32, i32
  }
  func.func @transform_7(%arg0: i32) -> (i32, i32) {
    %c0_i32 = arith.constant 0 : i32
    %c0_i32_0 = arith.constant 0 : i32
    %c0_i32_1 = arith.constant 0 : i32
    return %c0_i32, %c0_i32_0 : i32, i32
  }
  func.func @transform_8(%arg0: i32) -> (i32, i32) {
    %c0_i32 = arith.constant 0 : i32
    %c0_i32_0 = arith.constant 0 : i32
    %c0_i32_1 = arith.constant 0 : i32
    return %c0_i32, %c0_i32_0 : i32, i32
  }
  func.func @transform_9(%arg0: i32) -> (i32, i32) {
    %c0_i32 = arith.constant 0 : i32
    %c0_i32_0 = arith.constant 0 : i32
    %c0_i32_1 = arith.constant 0 : i32
    return %c0_i32, %c0_i32_0 : i32, i32
  }
  func.func @transform_10(%arg0: i32) -> (i32, i32) {
    %c0_i32 = arith.constant 0 : i32
    %c0_i32_0 = arith.constant 0 : i32
    %c0_i32_1 = arith.constant 0 : i32
    return %c0_i32, %c0_i32_0 : i32, i32
  }
  func.func @transform_11(%arg0: i32) -> (i32, i32) {
    %c0_i32 = arith.constant 0 : i32
    %c0_i32_0 = arith.constant 0 : i32
    %c0_i32_1 = arith.constant 0 : i32
    return %c0_i32, %c0_i32_0 : i32, i32
  }
  func.func @transform_12(%arg0: i32) -> (i32, i32) {
    %c0_i32 = arith.constant 0 : i32
    %c0_i32_0 = arith.constant 0 : i32
    %c0_i32_1 = arith.constant 0 : i32
    return %c0_i32, %c0_i32_0 : i32, i32
  }
  func.func @transform_13(%arg0: i32) -> (i32, i32) {
    %c0_i32 = arith.constant 0 : i32
    %c0_i32_0 = arith.constant 0 : i32
    %c0_i32_1 = arith.constant 0 : i32
    return %c0_i32, %c0_i32_0 : i32, i32
  }
  func.func @transform_14(%arg0: i32) -> (i32, i32) {
    %c0_i32 = arith.constant 0 : i32
    %c0_i32_0 = arith.constant 0 : i32
    %c0_i32_1 = arith.constant 0 : i32
    return %c0_i32, %c0_i32_0 : i32, i32
  }
  func.func @transform_15(%arg0: i32) -> (i32, i32) {
    %c0_i32 = arith.constant 0 : i32
    %c0_i32_0 = arith.constant 0 : i32
    %c0_i32_1 = arith.constant 0 : i32
    return %c0_i32, %c0_i32_0 : i32, i32
  }
  func.func @transform_16(%arg0: i32) -> (i32, i32) {
    %c0_i32 = arith.constant 0 : i32
    %c0_i32_0 = arith.constant 0 : i32
    %c0_i32_1 = arith.constant 0 : i32
    return %c0_i32, %c0_i32_0 : i32, i32
  }
}

</mosaic_0001>

<bundles_post_ra>
// kernel: bert_forward.1
= control target key start
LH: loop header
LB: loop body
LE: loop exit
PB: predicated region body
PF: predicated region fallthrough
CT: control target
= control target key end

     0   :  { %s1624_s0 = inlined_call_operand.vmem [shape: s32[2,8], index: 0, kind: input, shape index: {}]   ;;  %s1625_s1 = inlined_call_operand.vmem [shape: s32[16,1], index: 1, kind: input, shape index: {}]   ;;  %s1626_s2 = inlined_call_operand.vmem [shape: f32[32,32], index: 2, kind: input, shape index: {}]   ;;  %s1627_s3 = inlined_call_operand.vmem [shape: f32[16,32], index: 3, kind: input, shape index: {}]   ;;  %s1628_s4 = inlined_call_operand.vmem [shape: bf16[32,96], index: 4, kind: input, shape index: {}]   ;;  %s1629_s5 = inlined_call_operand.vmem [shape: f32[1,96], index: 5, kind: input, shape index: {}]   ;;  %s1630_s6 = inlined_call_operand.vmem [shape: bf16[32,32], index: 6, kind: input, shape index: {}]   ;;  %s1631_s7 = inlined_call_operand.vmem [shape: f32[1,32], index: 7, kind: input, shape index: {}]   ;;  %s1632_s8 = inlined_call_operand.vmem [shape: f32[1,32], index: 8, kind: input, shape index: {}]   ;;  %s1633_s9 = inlined_call_operand.vmem [shape: f32[1,32], index: 9, kind: input, shape index: {}]   ;;  %s1634_s10 = inlined_call_operand.vmem [shape: bf16[32,128], index: 10, kind: input, shape index: {}]   ;;  %s1635_s11 = inlined_call_operand.vmem [shape: f32[1,128], index: 11, kind: input, shape index: {}]   ;;  %s1636_s12 = inlined_call_operand.vmem [shape: bf16[128,32], index: 12, kind: input, shape index: {}]   ;;  %s1637_s13 = inlined_call_operand.vmem [shape: f32[1,32], index: 13, kind: input, shape index: {}]   ;;  %s1638_s14 = inlined_call_operand.vmem [shape: f32[1,32], index: 14, kind: input, shape index: {}]   ;;  %s1639_s15 = inlined_call_operand.vmem [shape: f32[1,32], index: 15, kind: input, shape index: {}]   ;;  %s1640_s16 = inlined_call_operand.hbm [shape: f32[16,32], index: 16, kind: output, shape index: {}]  }
   0x1   :  { %1641 = sst [smem:[#allocation5_spill]] %s1624_s0 }
   0x2   :  { %v55_v0 = vld [vmem:[%s1625_s1] sm:$0xff]  ;;  %v74_v1 = vld [vmem:[%s1626_s2 + $0x18] sm:$0xff]  ;;  %v1244_v2 = vmov 0   ;;  %v73_v3 = vld [vmem:[%s1626_s2 + $0x10] sm:$0xff] }
   0x3   :  { %1125 = vset.pattern.permute.xlu0 %v1244_v2  ;;  %96 = vmatpush.msra.mxu1 %v74_v1  ;;  %v72_v4 = vld [vmem:[%s1626_s2 + $0x8] sm:$0xff] }
   0x4   :  { %60 = vperm.xlu0 %1125, %v55_v0  }
   0x5   :  { %97 = vmatpush.msra.mxu1 %v73_v3 }
   0x7   :  { %98 = vmatpush.msra.mxu1 %v72_v4 }
   0x8   :  { %21 = vsyncpa [#allocation3], 0  ;;  %v56_v5 = vld [vmem:[%s1625_s1 + $0x8] sm:$0xff]  ;;  %v71_v6 = vld [vmem:[%s1626_s2] sm:$0xff]  ;;  %v57_v7 = vlaneseq  ;;  %vm77_vm0 = vcmask 261120   ;;  %v1245_v10 = vmov 0.0  }
   0x9   :  { %99 = vmatpush.msra.mxu1 %v71_v6  ;;  %v75_v14 = vld [vmem:[%s1627_s3] sm:$0xff]  ;;  %v76_v18 = vld [vmem:[%s1627_s3 + $0x8] sm:$0xff]  ;;  %v1246_v22 = vmov 32.0   ;;  %s1249_s28 = smov 120   ;;  %s1250_s29 = smov 96   ;;  %vm256_vm8 = vcmask 64512  }
   0xa   :  { %v58_v8 = vand.u32 127, %v57_v7  ;;  %1164 = vrcp.f32 %v1246_v22  ;;  %v1099_v39 = vld [vmem:[%s1628_s4 + $0x8] sm:$0xff]  ;;  %v1098_v40 = vld [vmem:[%s1628_s4] sm:$0xff]  ;;  %s1642_s0 = sld [smem:[#allocation5_spill]]  ;;  %s1251_s17 = smov 64   ;;  %vm559_vm14 = vcmask 1043456  }
   0xb   :  { %206 = vmatpush.bf16.msrb.mxu1 %v1099_v39  ;;  %v1156_v4 = vld [vmem:[%s1632_s8] ss:$0 sm:$0xff]  ;;  %s1247_s8 = smov 104   ;;  %s1252_s1 = smov 8   ;;  %vm749_vm15 = vcmask 130048  }
   0xc   :  { %63 = vperm.xlu0 %1125, %v56_v5   ;;  %s1253_s18 = smov 24   ;;  %s1254_s2 = smov 16  }
   0xd   :  { %s1006_s23 = sshll.u32 %s1640_s16, 4  ;;  %s1255_s24 = smov [#allocation2]   ;;  %s1007_s23 = int_to_ptr.hbm [resolvable:$true] %s1006_s23 }
   0xf   :  { %207 = vmatpush.bf16.msrb.mxu1 %v1098_v40 }
  0x10   :  { %v1165_v23 = vpop.eup %1164 }
  0x11   :  { %v116_v24 = vmul.f32 32.0, %v1165_v23  ;;  %vm120_vm3 = vweird.f32 %v1165_v23 }
  0x13   :  { %v117_v25 = vsub.f32 1.0, %v116_v24 }
  0x15   :  { %v118_v26 = vmul.f32 %v1165_v23, %v117_v25 }
  0x17   :  { %v119_v27 = vadd.f32 %v1165_v23, %v118_v26 }
  0x19   :  { %v1379_v28 = vsel %vm120_vm3, %v1165_v23, %v119_v27 }
  0x76   :  { %v61_v9 = vpop.permute.xlu0 %60 }
  0x77   :  { %vm65_vm1 = vcmp.eq.s32.totalorder %v61_v9, %v58_v8  ;;  %v1157_v9 = vld [vmem:[%s1633_s9] ss:$0 sm:$0xff]  ;;  %s1248_s9 = smov 112  }
  0x78   :  { %v1018_v11 = vsel %vm65_vm1, 1.0, %v1245_v10  ;;  %vm752_vm1 = vcmask 195584  }
  0x79   :  { %1020 = vmatmul.msk.f32.vlgmr.msra.gmra.mxu1 %vm77_vm0, %v1018_v11 }
  0x7e   :  { %v64_v12 = vpop.permute.xlu0 %63 }
  0x7f   :  { %vm66_vm2 = vcmp.eq.s32.totalorder %v64_v12, %v58_v8 }
  0x80   :  { %v1019_v13 = vsel %vm66_vm2, 1.0, %v1245_v10 }
  0x81   :  { %1021 = vmatmul.msk.f32.gmra.mxu1 %vm77_vm0, %v1019_v13 }
  0xf6   :  { %v101_v15 = vpop.f32.mrf.mxu1 }
  0xf7   :  { %v1368_v16 = vadd.f32 %v101_v15, %v75_v14 }
  0xf9   :  { %v109_v17 = vsel %vm77_vm0, %v1368_v16, 0.0 }
  0xfa   :  { %110 = vadd.xlane.f32.xlu1 %v109_v17 }
  0xfe   :  { %v104_v19 = vpop.f32.mrf.mxu1 }
  0xff   :  { %v1375_v20 = vadd.f32 %v104_v19, %v76_v18  ;;  %v1158_v18 = vld [vmem:[%s1629_s5] ss:$0 sm:$0xff] }
 0x101   :  { %v112_v21 = vsel %vm77_vm0, %v1375_v20, 0.0 }
 0x102   :  { %113 = vadd.xlane.f32.xlu1 %v112_v21 }
 0x16d   :  { %v111_v29 = vpop.xlane.xlu1 %110 }
 0x16e   :  { %v122_v30 = vmul.f32 %v1379_v28, %v111_v29 }
 0x170   :  { %v124_v31 = vsub.f32 %v1368_v16, %v122_v30 }
 0x172   :  { %v126_v32 = vmul.f32 %v124_v31, %v124_v31  ;;  %v167_v6 = vmul.f32 %v1156_v4, %v124_v31 }
 0x174   :  { %v128_v33 = vsel %vm77_vm0, %v126_v32, 0.0 }
 0x175   :  { %129 = vadd.xlane.f32.xlu2 %v128_v33  ;;  %v114_v34 = vpop.xlane.xlu1 %113 }
 0x176   :  { %v123_v35 = vmul.f32 %v1379_v28, %v114_v34 }
 0x178   :  { %v125_v36 = vsub.f32 %v1375_v20, %v123_v35 }
 0x17a   :  { %v127_v37 = vmul.f32 %v125_v36, %v125_v36  ;;  %v168_v7 = vmul.f32 %v1156_v4, %v125_v36 }
 0x17c   :  { %v131_v38 = vsel %vm77_vm0, %v127_v37, 0.0 }
 0x17d   :  { %132 = vadd.xlane.f32.xlu2 %v131_v38 }
 0x1e8   :  { %v130_v41 = vpop.xlane.xlu2 %129 }
 0x1e9   :  { %v134_v42 = vmul.f32 0.032258064, %v130_v41 }
 0x1eb   :  { %1166 = vrsqrt.f32 %v134_v42  ;;  %vm143_vm4 = vcmp.eq.f32.partialorder %v134_v42, inf  ;;  %v146_v55 = vand.u32 2147483648, %v134_v42  ;;  %vm145_vm5 = vcmp.eq.f32.partialorder %v134_v42, 0.0 }
 0x1f0   :  { %v133_v43 = vpop.xlane.xlu2 %132 }
 0x1f1   :  { %v1167_v44 = vpop.eup %1166  ;;  %v135_v45 = vmul.f32 0.032258064, %v133_v43 }
 0x1f2   :  { %v137_v46 = vmul.f32 %v1167_v44, %v134_v42 }
 0x1f3   :  { %1168 = vrsqrt.f32 %v135_v45  ;;  %vm155_vm6 = vcmp.eq.f32.partialorder %v135_v45, inf  ;;  %v158_v63 = vand.u32 2147483648, %v135_v45  ;;  %vm157_vm7 = vcmp.eq.f32.partialorder %v135_v45, 0.0 }
 0x1f4   :  { %v138_v47 = vmul.f32 %v1167_v44, %v137_v46 }
 0x1f6   :  { %v139_v48 = vmul.f32 0.5, %v138_v47 }
 0x1f8   :  { %v140_v49 = vsub.f32 1.5, %v139_v48 }
 0x1f9   :  { %v1169_v50 = vpop.eup %1168 }
 0x1fa   :  { %v141_v51 = vmul.f32 %v1167_v44, %v140_v49  ;;  %v149_v52 = vmul.f32 %v1169_v50, %v135_v45 }
 0x1fc   :  { %v142_v53 = vmul.f32 %v141_v51, %v134_v42  ;;  %v150_v54 = vmul.f32 %v1169_v50, %v149_v52 }
 0x1fe   :  { %v151_v56 = vmul.f32 0.5, %v150_v54  ;;  %v144_v57 = vsel %vm143_vm4, %v134_v42, %v142_v53 }
 0x1ff   :  { %v147_v58 = vsel %vm145_vm5, %v146_v55, %v144_v57 }
 0x200   :  { %v152_v59 = vsub.f32 1.5, %v151_v56  ;;  %v160_v61 = vadd.f32 1e-06, %v147_v58 }
 0x202   :  { %v153_v60 = vmul.f32 %v1169_v50, %v152_v59  ;;  %1170 = vrcp.f32 %v160_v61 }
 0x204   :  { %v154_v62 = vmul.f32 %v153_v60, %v135_v45 }
 0x206   :  { %v156_v0 = vsel %vm155_vm6, %v135_v45, %v154_v62 }
 0x207   :  { %v159_v1 = vsel %vm157_vm7, %v158_v63, %v156_v0 }
 0x208   :  { %v161_v3 = vadd.f32 1e-06, %v159_v1  ;;  %v1171_v5 = vpop.eup %1170 }
 0x209   :  { %v169_v8 = vmul.f32 %v1171_v5, %v167_v6 }
 0x20a   :  { %1172 = vrcp.f32 %v161_v3 }
 0x20b   :  { %v174_v13 = vadd.f32 %v1157_v9, %v169_v8 }
 0x210   :  { %v1173_v11 = vpop.eup %1172 }
 0x211   :  { %v170_v12 = vmul.f32 %v1173_v11, %v168_v7  ;;  %v242_v7 = vld [vmem:[%s1642_s0] sm:$0x3] }
 0x212   :  { %vm243_vm9 = vcmp.ne.s32.totalorder %v242_v7, 0 }
 0x213   :  { %v175_v14 = vadd.f32 %v1157_v9, %v170_v12 }
 0x215   :  { %v176_v15 = vpack.c.bf16 %v175_v14, %v174_v13  ;;  %v1031_v13 = vsel %vm243_vm9, 1.0, %v1245_v10 }
 0x216   :  { %vm249_vm10 = vcmp.ne.f32.partialorder %v1031_v13, 0.0 }
 0x217   :  { %1030 = vmatmul.msk.bf16.vlgmr.msrb.gmra.mxu1 %vm77_vm0, %v176_v15  ;;  %v444_v14 = vsel %vm249_vm10, 1, %v1244_v2  ;;  %v247_v15 = vrot.slane %v1031_v13, 1 }
 0x219   :  { %vm250_vm11 = vcmp.ne.f32.partialorder %v247_v15, 0.0 }
 0x294   :  { %v209_v17 = vpop.f32.mrf.mxu1 }
 0x295   :  { %v210_v19 = vadd.f32 %v1158_v18, %v209_v17  ;;  %v446_v17 = vperm.slane %v444_v14, 0 }
 0x297   :  { %v234_v24 = vpack.c.bf16 %v210_v19, %v210_v19  ;;  %vm1455_vm12 = vcmp.eq.s32.totalorder %v446_v17, 1 }
 0x299   :  { %v252_v25 = vunpack.c.l.b16 %v234_v24 }
 0x29b   :  { %v1403_v26 = vpack.c.b16 %v252_v25, %v252_v25 }
 0x29c   :  { %v211_v21 = vpop.f32.mrf.mxu1 }
 0x29d   :  { %v212_v22 = vadd.f32 %v1158_v18, %v211_v21 }
 0x29f   :  { %v1136_v23 = vpack.i.bf16 %v212_v22, %v210_v19  ;;  %v235_v27 = vpack.c.bf16 %v212_v22, %v212_v22  ;;  %v445_v19 = vsel %vm250_vm11, 1, %v1244_v2 }
 0x2a0   :  { %v447_v22 = vperm.slane %v445_v19, 0 }
 0x2a1   :  { %1137 = vrot.lane.b32.xlu2 %v1136_v23, %s1247_s8  ;;  %1132 = vrot.lane.b32.xlu1 %v1136_v23, %s1248_s9  ;;  %v277_v29 = vunpack.c.l.b16 %v235_v27 }
 0x2a2   :  { %1127 = vrot.lane.b32.xlu0 %v1136_v23, %s1249_s28  ;;  %vm1464_vm13 = vcmp.eq.s32.totalorder %v447_v22, 1 }
 0x2a3   :  { %v1407_v30 = vpack.c.b16 %v277_v29, %v277_v29 }
 0x2aa   :  { %254 = vrot.lane.b32.xlu0 %v1403_v26, %s1250_s29 }
 0x2b2   :  { %279 = vrot.lane.b32.xlu0 %v1407_v30, %s1250_s29 }
 0x2fb   :  { %v1138_v31 = vpop.permute.xlu2 %1137 }
 0x2fc   :  { %v1140_v37 = vunpack.i.h.bf16 %v1138_v31  ;;  %v1139_v39 = vunpack.i.l.bf16 %v1138_v31 }
 0x2fe   :  { %v241_v46 = vpack.c.bf16 %v1140_v37, %v1140_v37  ;;  %v240_v48 = vpack.c.bf16 %v1139_v39, %v1139_v39 }
 0x300   :  { %v421_v54 = vunpack.c.l.b16 %v241_v46  ;;  %v397_v55 = vunpack.c.l.b16 %v240_v48 }
 0x302   :  { %v1424_v57 = vpack.c.b16 %v421_v54, %v421_v54  ;;  %v1426_v58 = vpack.c.b16 %v397_v55, %v397_v55 }
 0x313   :  { %v1133_v32 = vpop.permute.xlu1 %1132 }
 0x314   :  { %v1134_v33 = vunpack.i.l.bf16 %v1133_v32  ;;  %v1128_v34 = vpop.permute.xlu0 %1127  ;;  %v1135_v40 = vunpack.i.h.bf16 %v1133_v32 }
 0x315   :  { %v1130_v35 = vunpack.i.h.bf16 %v1128_v34  ;;  %v1129_v36 = vunpack.i.l.bf16 %v1128_v34 }
 0x316   :  { %v238_v38 = vpack.c.bf16 %v1134_v33, %v1134_v33  ;;  %v239_v49 = vpack.c.bf16 %v1135_v40, %v1135_v40 }
 0x317   :  { %v237_v41 = vpack.c.bf16 %v1130_v35, %v1130_v35  ;;  %v236_v42 = vpack.c.bf16 %v1129_v36, %v1129_v36 }
 0x318   :  { %v349_v43 = vunpack.c.l.b16 %v238_v38  ;;  %v373_v56 = vunpack.c.l.b16 %v239_v49 }
 0x319   :  { %v325_v44 = vunpack.c.l.b16 %v237_v41  ;;  %v301_v45 = vunpack.c.l.b16 %v236_v42 }
 0x31a   :  { %v1411_v47 = vpack.c.b16 %v349_v43, %v349_v43  ;;  %v1428_v59 = vpack.c.b16 %v373_v56, %v373_v56 }
 0x31b   :  { %v1413_v50 = vpack.c.b16 %v325_v44, %v325_v44  ;;  %v1415_v51 = vpack.c.b16 %v301_v45, %v301_v45 }
 0x31c   :  { %v255_v52 = vpop.permute.xlu0 %254  ;;  %351 = vrot.lane.b32.xlu1 %v1411_v47, %s1250_s29 }
 0x31d   :  { %327 = vrot.lane.b32.xlu2 %v1413_v50, %s1250_s29  ;;  %303 = vrot.lane.b32.xlu0 %v1415_v51, %s1250_s29  ;;  %v261_v53 = vsel %vm256_vm8, %v255_v52, 0 }
 0x31e   :  { %270 = vmatpush.bf16.xpose.msra.mxu2 %v261_v53 }
 0x324   :  { %v280_v60 = vpop.permute.xlu0 %279  ;;  %423 = vrot.lane.b32.xlu1 %v1424_v57, %s1250_s29 }
 0x325   :  { %399 = vrot.lane.b32.xlu2 %v1426_v58, %s1250_s29  ;;  %375 = vrot.lane.b32.xlu0 %v1428_v59, %s1250_s29  ;;  %v285_v61 = vsel %vm256_vm8, %v280_v60, 0 }
 0x326   :  { %1032 = vmatmul.msk.bf16.vlgmr.msra.gmra.mxu2 %vm256_vm8, %v234_v24  ;;  %294 = vmatpush.bf16.xpose.msra.mxu3 %v285_v61 }
 0x32d   :  { %1033 = vmatmul.msk.bf16.vlgmr.msra.gmra.mxu3 %vm256_vm8, %v235_v27 }
 0x377   :  { %v328_v62 = vpop.permute.xlu2 %327 }
 0x378   :  { %v333_v63 = vsel %vm256_vm8, %v328_v62, 0 }
 0x379   :  { %342 = vmatpush.bf16.xpose.msra.mxu1 %v333_v63 }
 0x37f   :  { %v400_v0 = vpop.permute.xlu2 %399 }
 0x380   :  { %1035 = vmatmul.msk.bf16.vlgmr.msra.gmra.mxu1 %vm256_vm8, %v237_v41  ;;  %v405_v6 = vsel %vm256_vm8, %v400_v0, 0 }
 0x38e   :  { %v352_v1 = vpop.permute.xlu1 %351 }
 0x38f   :  { %v304_v3 = vpop.permute.xlu0 %303  ;;  %v357_v4 = vsel %vm256_vm8, %v352_v1, 0 }
 0x390   :  { %v309_v5 = vsel %vm256_vm8, %v304_v3, 0  ;;  %366 = vmatpush.bf16.xpose.msrb.mxu2 %v357_v4 }
 0x391   :  { %318 = vmatpush.bf16.xpose.msra.mxu0 %v309_v5 }
 0x396   :  { %v424_v8 = vpop.permute.xlu1 %423 }
 0x397   :  { %v429_v9 = vsel %vm256_vm8, %v424_v8, 0  ;;  %v376_v11 = vpop.permute.xlu0 %375  ;;  %1036 = vmatmul.msk.bf16.vlgmr.msrb.gmra.mxu2 %vm256_vm8, %v238_v38 }
 0x398   :  { %1034 = vmatmul.msk.bf16.vlgmr.msra.gmra.mxu0 %vm256_vm8, %v236_v42  ;;  %v381_v12 = vsel %vm256_vm8, %v376_v11, 0  ;;  %438 = vmatpush.bf16.xpose.msrb.mxu1 %v429_v9 }
 0x399   :  { %414 = vmatpush.bf16.xpose.msrb.mxu0 %v405_v6  ;;  %390 = vmatpush.bf16.xpose.msrb.mxu3 %v381_v12 }
 0x39f   :  { %1039 = vmatmul.msk.bf16.vlgmr.msrb.gmra.mxu1 %vm256_vm8, %v241_v46 }
 0x3a0   :  { %1037 = vmatmul.msk.bf16.vlgmr.msrb.gmra.mxu3 %vm256_vm8, %v239_v49 }
 0x3a8   :  { %1038 = vmatmul.msk.bf16.vlgmr.msrb.gmra.mxu0 %vm256_vm8, %v240_v48 }
 0x3a9   :  { %v272_v21 = vpop.f32.mrf.mxu2 }
 0x3aa   :  { %v450_v10 = vsel %vm1455_vm12, %v272_v21, -1e+09 }
 0x3ab   :  { %v458_v23 = vsel %vm256_vm8, %v450_v10, -inf }
 0x3ac   :  { %459 = vmax.xlane.f32.xlu0 %v458_v23 }
 0x3b0   :  { %v296_v25 = vpop.f32.mrf.mxu3 }
 0x3b1   :  { %v274_v27 = vpop.f32.mrf.mxu2  ;;  %v451_v29 = vsel %vm1464_vm13, %v296_v25, -1e+09 }
 0x3b2   :  { %v461_v2 = vsel %vm256_vm8, %v451_v29, -inf }
 0x3b3   :  { %462 = vmax.xlane.f32.xlu2 %v461_v2 }
 0x3b8   :  { %v298_v31 = vpop.f32.mrf.mxu3 }
 0x3fd   :  { %v344_v32 = vpop.f32.mrf.mxu1 }
 0x3fe   :  { %v453_v33 = vsel %vm1464_vm13, %v344_v32, -1e+09 }
 0x3ff   :  { %v467_v34 = vsel %vm256_vm8, %v453_v33, -inf }
 0x400   :  { %468 = vmax.xlane.f32.xlu2 %v467_v34 }
 0x405   :  { %v346_v35 = vpop.f32.mrf.mxu1 }
 0x415   :  { %v320_v36 = vpop.f32.mrf.mxu0 }
 0x416   :  { %v452_v37 = vsel %vm1455_vm12, %v320_v36, -1e+09 }
 0x417   :  { %v464_v38 = vsel %vm256_vm8, %v452_v37, -inf }
 0x418   :  { %554 = vrot.lane.b32.xlu2 %v1403_v26, %s1251_s17  ;;  %465 = vmax.xlane.f32.xlu1 %v464_v38 }
 0x41a   :  { %v368_v39 = vpop.f32.mrf.mxu2 }
 0x41b   :  { %v454_v40 = vsel %vm1455_vm12, %v368_v39, -1e+09 }
 0x41c   :  { %v440_v41 = vpop.f32.mrf.mxu1  ;;  %v470_v42 = vsel %vm256_vm8, %v454_v40, -inf }
 0x41d   :  { %v322_v43 = vpop.f32.mrf.mxu0  ;;  %471 = vmax.xlane.f32.xlu0 %v470_v42  ;;  %v457_v1 = vsel %vm1464_vm13, %v440_v41, -1e+09 }
 0x41e   :  { %v479_v4 = vsel %vm256_vm8, %v457_v1, -inf }
 0x422   :  { %v370_v44 = vpop.f32.mrf.mxu2 }
 0x423   :  { %v392_v45 = vpop.f32.mrf.mxu3 }
 0x424   :  { %v442_v46 = vpop.f32.mrf.mxu1  ;;  %v455_v63 = vsel %vm1464_vm13, %v392_v45, -1e+09 }
 0x425   :  { %v416_v48 = vpop.f32.mrf.mxu0 }
 0x426   :  { %v463_v26 = vpop.xlane.xlu2 %462  ;;  %v456_v55 = vsel %vm1455_vm12, %v416_v48, -1e+09 }
 0x427   :  { %v483_v53 = vsub.f32 %v451_v29, %v463_v26  ;;  %v476_v56 = vsel %vm256_vm8, %v456_v55, -inf }
 0x429   :  { %v492_v54 = vmul.f32 1.442695, %v483_v53 }
 0x42b   :  { %v394_v49 = vpop.f32.mrf.mxu3  ;;  %1174 = vpow2.f32 %v492_v54 }
 0x42d   :  { %v418_v52 = vpop.f32.mrf.mxu0 }
 0x431   :  { %597 = vrot.lane.b32.xlu1 %v1415_v51, %s1251_s17  ;;  %576 = vrot.lane.b32.xlu0 %v1407_v30, %s1251_s17  ;;  %v1175_v60 = vpop.eup %1174  ;;  %v460_v51 = vpop.xlane.xlu0 %459 }
 0x432   :  { %v509_v61 = vsel %vm256_vm8, %v1175_v60, 0.0  ;;  %v482_v62 = vsub.f32 %v450_v10, %v460_v51 }
 0x434   :  { %v490_v30 = vmul.f32 1.442695, %v482_v62 }
 0x436   :  { %1176 = vpow2.f32 %v490_v30 }
 0x439   :  { %618 = vrot.lane.b32.xlu0 %v1413_v50, %s1251_s17  ;;  %v473_v50 = vsel %vm256_vm8, %v455_v63, -inf }
 0x43c   :  { %v1495_v0 = vpop.eup %1176 }
 0x43d   :  { %v506_v3 = vsel %vm256_vm8, %v1495_v0, 0.0 }
 0x441   :  { %477 = vmax.xlane.f32.xlu2 %v476_v56 }
 0x449   :  { %510 = vadd.xlane.f32.xlu2 %v509_v61 }
 0x45b   :  { %474 = vmax.xlane.f32.xlu1 %v473_v50 }
 0x463   :  { %507 = vadd.xlane.f32.xlu1 %v506_v3  ;;  %480 = vmax.xlane.f32.xlu0 %v479_v4 }
 0x473   :  { %v469_v5 = vpop.xlane.xlu2 %468 }
 0x474   :  { %v485_v6 = vsub.f32 %v453_v33, %v469_v5 }
 0x476   :  { %v496_v7 = vmul.f32 1.442695, %v485_v6 }
 0x478   :  { %1178 = vpow2.f32 %v496_v7 }
 0x47b   :  { %v555_v8 = vpop.permute.xlu2 %554 }
 0x47c   :  { %v561_v9 = vsel %vm559_vm14, %v555_v8, 0 }
 0x47d   :  { %570 = vmatpush.bf16.msra.mxu2 %v561_v9 }
 0x47e   :  { %v1503_v11 = vpop.eup %1178 }
 0x47f   :  { %v515_v12 = vsel %vm256_vm8, %v1503_v11, 0.0 }
 0x480   :  { %516 = vadd.xlane.f32.xlu1 %v515_v12 }
 0x48b   :  { %v466_v13 = vpop.xlane.xlu1 %465 }
 0x48c   :  { %v484_v14 = vsub.f32 %v452_v37, %v466_v13 }
 0x48e   :  { %v494_v15 = vmul.f32 1.442695, %v484_v14 }
 0x490   :  { %1180 = vpow2.f32 %v494_v15  ;;  %v472_v17 = vpop.xlane.xlu0 %471 }
 0x491   :  { %v486_v18 = vsub.f32 %v454_v40, %v472_v17 }
 0x493   :  { %v498_v19 = vmul.f32 1.442695, %v486_v18 }
 0x495   :  { %1182 = vpow2.f32 %v498_v19 }
 0x496   :  { %v1181_v21 = vpop.eup %1180 }
 0x497   :  { %v512_v10 = vsel %vm256_vm8, %v1181_v21, 0.0 }
 0x498   :  { %513 = vadd.xlane.f32.xlu0 %v512_v10 }
 0x49b   :  { %v1508_v22 = vpop.eup %1182 }
 0x49c   :  { %v518_v23 = vsel %vm256_vm8, %v1508_v22, 0.0 }
 0x49d   :  { %519 = vadd.xlane.f32.xlu2 %v518_v23 }
 0x4a3   :  { %v598_v24 = vpop.permute.xlu1 %597  ;;  %v577_v25 = vpop.permute.xlu0 %576 }
 0x4a4   :  { %v603_v27 = vsel %vm559_vm14, %v598_v24, 0  ;;  %v582_v29 = vsel %vm559_vm14, %v577_v25, 0 }
 0x4a5   :  { %612 = vmatpush.bf16.msra.mxu0 %v603_v27  ;;  %591 = vmatpush.bf16.msra.mxu3 %v582_v29 }
 0x4ab   :  { %v619_v2 = vpop.permute.xlu0 %618 }
 0x4ac   :  { %660 = vrot.lane.b32.xlu0 %v1428_v59, %s1251_s17  ;;  %v624_v31 = vsel %vm559_vm14, %v619_v2, 0 }
 0x4ad   :  { %633 = vmatpush.bf16.msra.mxu1 %v624_v31 }
 0x4b4   :  { %v478_v32 = vpop.xlane.xlu2 %477 }
 0x4b5   :  { %v488_v35 = vsub.f32 %v456_v55, %v478_v32 }
 0x4b7   :  { %v502_v38 = vmul.f32 1.442695, %v488_v35 }
 0x4bc   :  { %v511_v33 = vpop.xlane.xlu2 %510 }
 0x4bd   :  { %1184 = vrcp.f32 %v511_v33 }
 0x4be   :  { %1186 = vpow2.f32 %v502_v38 }
 0x4c3   :  { %v1185_v34 = vpop.eup %1184 }
 0x4c4   :  { %v539_v36 = vmul.f32 %v1185_v34, %v1175_v60  ;;  %v1187_v42 = vpop.eup %1186 }
 0x4c5   :  { %v524_v59 = vsel %vm256_vm8, %v1187_v42, 0.0 }
 0x4c6   :  { %v547_v37 = vpack.c.bf16 %v539_v36, %v539_v36 }
 0x4c8   :  { %1041 = vmatmul.msk.bf16.vlgmr.msra.gmra.mxu3 %vm256_vm8, %v547_v37 }
 0x4ce   :  { %v475_v39 = vpop.xlane.xlu1 %474 }
 0x4cf   :  { %v487_v40 = vsub.f32 %v455_v63, %v475_v39 }
 0x4d1   :  { %v500_v41 = vmul.f32 1.442695, %v487_v40 }
 0x4d3   :  { %1188 = vpow2.f32 %v500_v41 }
 0x4d6   :  { %525 = vadd.xlane.f32.xlu0 %v524_v59  ;;  %v508_v43 = vpop.xlane.xlu1 %507  ;;  %v481_v44 = vpop.xlane.xlu0 %480 }
 0x4d7   :  { %1190 = vrcp.f32 %v508_v43  ;;  %v489_v45 = vsub.f32 %v457_v1, %v481_v44  ;;  %v1101_v44 = vld [vmem:[%s1630_s6 + $0x8] sm:$0xff] }
 0x4d9   :  { %v1189_v46 = vpop.eup %1188  ;;  %v504_v48 = vmul.f32 1.442695, %v489_v45  ;;  %v1100_v45 = vld [vmem:[%s1630_s6] sm:$0xff] }
 0x4da   :  { %v521_v49 = vsel %vm256_vm8, %v1189_v46, 0.0 }
 0x4db   :  { %1192 = vpow2.f32 %v504_v48  ;;  %522 = vadd.xlane.f32.xlu1 %v521_v49 }
 0x4dd   :  { %v1191_v52 = vpop.eup %1190 }
 0x4de   :  { %v538_v26 = vmul.f32 %v1191_v52, %v1495_v0 }
 0x4e0   :  { %v546_v53 = vpack.c.bf16 %v538_v26, %v538_v26 }
 0x4e1   :  { %v1193_v54 = vpop.eup %1192 }
 0x4e2   :  { %1040 = vmatmul.msk.bf16.vlgmr.msra.gmra.mxu2 %vm256_vm8, %v546_v53  ;;  %v527_v55 = vsel %vm256_vm8, %v1193_v54, 0.0 }
 0x4e3   :  { %528 = vadd.xlane.f32.xlu2 %v527_v55 }
 0x4ea   :  { %702 = vrot.lane.b32.xlu0 %v1424_v57, %s1251_s17 }
 0x4f3   :  { %v517_v56 = vpop.xlane.xlu1 %516 }
 0x4f4   :  { %1194 = vrcp.f32 %v517_v56  ;;  %639 = vrot.lane.b32.xlu1 %v1411_v47, %s1251_s17 }
 0x4fa   :  { %v1195_v60 = vpop.eup %1194 }
 0x4fb   :  { %v541_v61 = vmul.f32 %v1195_v60, %v1503_v11  ;;  %681 = vrot.lane.b32.xlu2 %v1426_v58, %s1251_s17 }
 0x4fd   :  { %v549_v51 = vpack.c.bf16 %v541_v61, %v541_v61 }
 0x4ff   :  { %1043 = vmatmul.msk.bf16.vlgmr.msra.gmra.mxu1 %vm256_vm8, %v549_v51 }
 0x50b   :  { %v514_v62 = vpop.xlane.xlu0 %513 }
 0x50c   :  { %1196 = vrcp.f32 %v514_v62 }
 0x510   :  { %v520_v1 = vpop.xlane.xlu2 %519 }
 0x512   :  { %v1197_v30 = vpop.eup %1196 }
 0x513   :  { %v540_v63 = vmul.f32 %v1197_v30, %v1181_v21 }
 0x515   :  { %v548_v50 = vpack.c.bf16 %v540_v63, %v540_v63 }
 0x517   :  { %1042 = vmatmul.msk.bf16.vlgmr.msra.gmra.mxu0 %vm256_vm8, %v548_v50 }
 0x51e   :  { %v661_v57 = vpop.permute.xlu0 %660 }
 0x51f   :  { %v666_v0 = vsel %vm559_vm14, %v661_v57, 0  ;;  %v1159_v57 = vld [vmem:[%s1631_s7] ss:$0 sm:$0xff] }
 0x520   :  { %675 = vmatpush.bf16.msrb.mxu3 %v666_v0 }
 0x549   :  { %v526_v58 = vpop.xlane.xlu0 %525 }
 0x54b   :  { %v1533_v47 = vpop.f32.mrf.mxu3 }
 0x54e   :  { %v523_v3 = vpop.xlane.xlu1 %522 }
 0x54f   :  { %1198 = vrcp.f32 %v523_v3 }
 0x550   :  { %1200 = vrcp.f32 %v526_v58 }
 0x553   :  { %v595_v4 = vpop.f32.mrf.mxu3 }
 0x555   :  { %v1199_v5 = vpop.eup %1198 }
 0x556   :  { %v543_v6 = vmul.f32 %v1199_v5, %v1189_v46  ;;  %v529_v7 = vpop.xlane.xlu2 %528  ;;  %v1201_v9 = vpop.eup %1200 }
 0x557   :  { %1202 = vrcp.f32 %v529_v7  ;;  %v544_v13 = vmul.f32 %v1201_v9, %v1187_v42 }
 0x558   :  { %v551_v8 = vpack.c.bf16 %v543_v6, %v543_v6  ;;  %1204 = vrcp.f32 %v520_v1 }
 0x559   :  { %v552_v21 = vpack.c.bf16 %v544_v13, %v544_v13 }
 0x55a   :  { %1045 = vmatmul.msk.bf16.vlgmr.msrb.gmra.mxu3 %vm256_vm8, %v551_v8 }
 0x55c   :  { %v703_v11 = vpop.permute.xlu0 %702 }
 0x55d   :  { %v1203_v12 = vpop.eup %1202  ;;  %v708_v14 = vsel %vm559_vm14, %v703_v11, 0 }
 0x55e   :  { %v545_v15 = vmul.f32 %v1203_v12, %v1193_v54  ;;  %717 = vmatpush.bf16.msrb.mxu1 %v708_v14  ;;  %v682_v17 = vpop.permute.xlu2 %681  ;;  %v1205_v10 = vpop.eup %1204 }
 0x55f   :  { %v687_v18 = vsel %vm559_vm14, %v682_v17, 0  ;;  %v542_v23 = vmul.f32 %v1205_v10, %v1508_v22  ;;  %v1103_v17 = vld [vmem:[%s1634_s10 + $0x8] sm:$0xff] }
 0x560   :  { %v553_v19 = vpack.c.bf16 %v545_v15, %v545_v15  ;;  %696 = vmatpush.bf16.msrb.mxu0 %v687_v18  ;;  %887 = vmatpush.bf16.msra.mxu3 %v1103_v17 }
 0x561   :  { %v550_v29 = vpack.c.bf16 %v542_v23, %v542_v23 }
 0x562   :  { %1047 = vmatmul.msk.bf16.vlgmr.msrb.gmra.mxu1 %vm256_vm8, %v553_v19  ;;  %v1102_v19 = vld [vmem:[%s1634_s10] sm:$0xff]  ;;  %s1004_s10 = sshll.u32 %s1255_s24, 4  ;;  %s1005_s10 = int_to_ptr.vmem [resolvable:$true] %s1004_s10 }
 0x563   :  { %1046 = vmatmul.msk.bf16.vlgmr.msrb.gmra.mxu0 %vm256_vm8, %v552_v21 }
 0x564   :  { %888 = vmatpush.bf16.msra.mxu3 %v1102_v19 }
 0x565   :  { %v572_v24 = vpop.f32.mrf.mxu2 }
 0x566   :  { %v640_v25 = vpop.permute.xlu1 %639 }
 0x567   :  { %v645_v27 = vsel %vm559_vm14, %v640_v25, 0 }
 0x568   :  { %654 = vmatpush.bf16.msrb.mxu2 %v645_v27 }
 0x56b   :  { %1044 = vmatmul.msk.bf16.vlgmr.msrb.gmra.mxu2 %vm256_vm8, %v550_v29 }
 0x56c   :  { %785 = vmatpush.bf16.msra.mxu2 %v1101_v44 }
 0x56d   :  { %v574_v2 = vpop.f32.mrf.mxu2 }
 0x570   :  { %786 = vmatpush.bf16.msra.mxu2 %v1100_v45  ;;  %v1160_v45 = vld [vmem:[%s1638_s14] ss:$0 sm:$0xff] }
 0x57c   :  { %v635_v31 = vpop.f32.mrf.mxu1 }
 0x584   :  { %v637_v32 = vpop.f32.mrf.mxu1 }
 0x594   :  { %v614_v33 = vpop.f32.mrf.mxu0 }
 0x595   :  { %v1141_v34 = vpack.i.bf16 %v635_v31, %v614_v33 }
 0x597   :  { %1142 = vrot.lane.b32.xlu1 %v1141_v34, %s1252_s1 }
 0x59c   :  { %v616_v35 = vpop.f32.mrf.mxu0 }
 0x5dd   :  { %v677_v36 = vpop.f32.mrf.mxu3 }
 0x5df   :  { %v719_v37 = vpop.f32.mrf.mxu1 }
 0x5e0   :  { %v698_v22 = vpop.f32.mrf.mxu0 }
 0x5e1   :  { %v1151_v38 = vpack.i.bf16 %v719_v37, %v698_v22 }
 0x5e3   :  { %1152 = vrot.lane.b32.xlu0 %v1151_v38, %s1253_s18 }
 0x5e5   :  { %v679_v39 = vpop.f32.mrf.mxu3 }
 0x5e7   :  { %v721_v40 = vpop.f32.mrf.mxu1 }
 0x5e8   :  { %v700_v41 = vpop.f32.mrf.mxu0 }
 0x5ee   :  { %v656_v42 = vpop.f32.mrf.mxu2 }
 0x5ef   :  { %v1146_v59 = vpack.i.bf16 %v677_v36, %v656_v42 }
 0x5f1   :  { %1147 = vrot.lane.b32.xlu2 %v1146_v59, %s1254_s2 }
 0x5f6   :  { %v658_v43 = vpop.f32.mrf.mxu2 }
 0x609   :  { %v1143_v46 = vpop.permute.xlu1 %1142 }
 0x60a   :  { %v1145_v49 = vunpack.i.h.bf16 %v1143_v46  ;;  %v1144_v52 = vunpack.i.l.bf16 %v1143_v46 }
 0x60c   :  { %v748_v55 = vsel %vm256_vm8, %v1533_v47, %v1145_v49  ;;  %v747_v56 = vsel %vm256_vm8, %v572_v24, %v1144_v52 }
 0x64b   :  { %v1148_v48 = vpop.permute.xlu2 %1147 }
 0x64c   :  { %v1150_v26 = vunpack.i.h.bf16 %v1148_v48  ;;  %v1149_v53 = vunpack.i.l.bf16 %v1148_v48 }
 0x64e   :  { %v751_v51 = vsel %vm749_vm15, %v748_v55, %v1150_v26  ;;  %v750_v62 = vsel %vm749_vm15, %v747_v56, %v1149_v53  ;;  %v1161_v26 = vld [vmem:[%s1639_s15] ss:$0 sm:$0xff] }
 0x655   :  { %v1153_v54 = vpop.permute.xlu0 %1152 }
 0x656   :  { %v1155_v60 = vunpack.i.h.bf16 %v1153_v54  ;;  %v1154_v61 = vunpack.i.l.bf16 %v1153_v54 }
 0x658   :  { %v754_v30 = vsel %vm752_vm1, %v751_v51, %v1155_v60  ;;  %v753_v63 = vsel %vm752_vm1, %v750_v62, %v1154_v61  ;;  %v1111_v61 = vld [vmem:[%s1636_s12 + $0x38] sm:$0xff]  ;;  %v1110_v51 = vld [vmem:[%s1636_s12 + $0x30] sm:$0xff]  ;;  %v1109_v62 = vld [vmem:[%s1636_s12 + $0x28] sm:$0xff] }
 0x659   :  { %v755_v50 = vpack.c.bf16 %v754_v30, %v753_v63  ;;  %982 = vmatpush.bf16.msra.mxu0 %v1111_v61  ;;  %v1108_v30 = vld [vmem:[%s1636_s12 + $0x20] sm:$0xff]  ;;  %v1107_v63 = vld [vmem:[%s1636_s12 + $0x18] sm:$0xff] }
 0x65b   :  { %1056 = vmatmul.msk.bf16.vlgmr.msra.gmra.mxu2 %vm77_vm0, %v755_v50  ;;  %v1106_v50 = vld [vmem:[%s1636_s12 + $0x10] sm:$0xff] }
 0x65d   :  { %983 = vmatpush.bf16.msra.mxu0 %v1110_v51 }
 0x661   :  { %984 = vmatpush.bf16.msra.mxu0 %v1109_v62 }
 0x665   :  { %985 = vmatpush.bf16.msra.mxu0 %v1108_v30 }
 0x669   :  { %986 = vmatpush.bf16.msra.mxu0 %v1107_v63 }
 0x66d   :  { %987 = vmatpush.bf16.msra.mxu0 %v1106_v50 }
 0x6de   :  { %v788_v0 = vpop.f32.mrf.mxu2 }
 0x6df   :  { %v789_v1 = vadd.f32 %v1159_v57, %v788_v0  ;;  %v1162_v0 = vld [vmem:[%s1635_s11] ss:$0 sm:$0xff] }
 0x6e1   :  { %v1558_v3 = vadd.f32 %v789_v1, %v1368_v16  ;;  %v1104_v1 = vld [vmem:[%s1636_s12] sm:$0xff] }
 0x6e3   :  { %v797_v47 = vsel %vm77_vm0, %v1558_v3, 0.0 }
 0x6e4   :  { %798 = vadd.xlane.f32.xlu1 %v797_v47 }
 0x6e6   :  { %v790_v58 = vpop.f32.mrf.mxu2 }
 0x6e7   :  { %v791_v4 = vadd.f32 %v1159_v57, %v790_v58  ;;  %v1105_v57 = vld [vmem:[%s1636_s12 + $0x8] sm:$0xff] }
 0x6e8   :  { %988 = vmatpush.bf16.msra.mxu0 %v1105_v57 }
 0x6e9   :  { %v1563_v5 = vadd.f32 %v791_v4, %v1375_v20 }
 0x6eb   :  { %v800_v6 = vsel %vm77_vm0, %v1563_v5, 0.0 }
 0x6ec   :  { %801 = vadd.xlane.f32.xlu2 %v800_v6  ;;  %989 = vmatpush.bf16.msra.mxu0 %v1104_v1 }
 0x757   :  { %v799_v7 = vpop.xlane.xlu1 %798 }
 0x758   :  { %v803_v8 = vmul.f32 %v799_v7, %v1379_v28 }
 0x75a   :  { %v805_v9 = vsub.f32 %v1558_v3, %v803_v8 }
 0x75c   :  { %v807_v16 = vmul.f32 %v805_v9, %v805_v9  ;;  %v848_v48 = vmul.f32 %v1160_v45, %v805_v9 }
 0x75e   :  { %v809_v11 = vsel %vm77_vm0, %v807_v16, 0.0 }
 0x75f   :  { %v802_v12 = vpop.xlane.xlu2 %801  ;;  %810 = vadd.xlane.f32.xlu0 %v809_v11 }
 0x760   :  { %v804_v13 = vmul.f32 %v802_v12, %v1379_v28 }
 0x762   :  { %v806_v14 = vsub.f32 %v1563_v5, %v804_v13 }
 0x764   :  { %v808_v20 = vmul.f32 %v806_v14, %v806_v14  ;;  %v849_v49 = vmul.f32 %v1160_v45, %v806_v14 }
 0x766   :  { %v812_v15 = vsel %vm77_vm0, %v808_v20, 0.0 }
 0x767   :  { %813 = vadd.xlane.f32.xlu1 %v812_v15 }
 0x7d2   :  { %v811_v18 = vpop.xlane.xlu0 %810 }
 0x7d3   :  { %v815_v21 = vmul.f32 0.032258064, %v811_v18 }
 0x7d5   :  { %1206 = vrsqrt.f32 %v815_v21  ;;  %vm824_vm2 = vcmp.eq.f32.partialorder %v815_v21, inf  ;;  %v827_v35 = vand.u32 2147483648, %v815_v21  ;;  %vm826_vm3 = vcmp.eq.f32.partialorder %v815_v21, 0.0 }
 0x7da   :  { %v814_v28 = vpop.xlane.xlu1 %813 }
 0x7db   :  { %v1207_v10 = vpop.eup %1206  ;;  %v816_v23 = vmul.f32 0.032258064, %v814_v28 }
 0x7dc   :  { %v818_v24 = vmul.f32 %v1207_v10, %v815_v21 }
 0x7dd   :  { %1208 = vrsqrt.f32 %v816_v23  ;;  %vm836_vm4 = vcmp.eq.f32.partialorder %v816_v23, inf  ;;  %v839_v42 = vand.u32 2147483648, %v816_v23  ;;  %vm838_vm5 = vcmp.eq.f32.partialorder %v816_v23, 0.0 }
 0x7de   :  { %v819_v25 = vmul.f32 %v1207_v10, %v818_v24 }
 0x7e0   :  { %v820_v27 = vmul.f32 0.5, %v819_v25 }
 0x7e2   :  { %v821_v29 = vsub.f32 1.5, %v820_v27  ;;  %v1163_v27 = vld [vmem:[%s1637_s13] ss:$0 sm:$0xff]  ;;  %s1256_s13 = smov 128  }
 0x7e3   :  { %v1209_v2 = vpop.eup %1208 }
 0x7e4   :  { %v822_v31 = vmul.f32 %v1207_v10, %v821_v29  ;;  %v830_v32 = vmul.f32 %v1209_v2, %v816_v23 }
 0x7e6   :  { %v823_v33 = vmul.f32 %v822_v31, %v815_v21  ;;  %v831_v34 = vmul.f32 %v1209_v2, %v830_v32 }
 0x7e8   :  { %v825_v36 = vsel %vm824_vm2, %v815_v21, %v823_v33  ;;  %v832_v37 = vmul.f32 0.5, %v831_v34 }
 0x7e9   :  { %v828_v22 = vsel %vm826_vm3, %v827_v35, %v825_v36 }
 0x7ea   :  { %v833_v38 = vsub.f32 1.5, %v832_v37  ;;  %v841_v40 = vadd.f32 1e-06, %v828_v22 }
 0x7ec   :  { %v834_v39 = vmul.f32 %v1209_v2, %v833_v38  ;;  %1210 = vrcp.f32 %v841_v40 }
 0x7ee   :  { %v835_v41 = vmul.f32 %v834_v39, %v816_v23 }
 0x7f0   :  { %v837_v59 = vsel %vm836_vm4, %v816_v23, %v835_v41 }
 0x7f1   :  { %v840_v43 = vsel %vm838_vm5, %v839_v42, %v837_v59 }
 0x7f2   :  { %v842_v44 = vadd.f32 1e-06, %v840_v43  ;;  %v1211_v46 = vpop.eup %1210 }
 0x7f3   :  { %v850_v52 = vmul.f32 %v1211_v46, %v848_v48 }
 0x7f4   :  { %1212 = vrcp.f32 %v842_v44 }
 0x7f5   :  { %v855_v55 = vadd.f32 %v1161_v26, %v850_v52 }
 0x7fa   :  { %v1213_v53 = vpop.eup %1212 }
 0x7fb   :  { %v851_v54 = vmul.f32 %v1213_v53, %v849_v49 }
 0x7fd   :  { %v856_v56 = vadd.f32 %v1161_v26, %v851_v54 }
 0x7ff   :  { %v857_v60 = vpack.c.bf16 %v856_v56, %v855_v55 }
 0x801   :  { %1065 = vmatmul.msk.bf16.vlgmr.msra.gmra.mxu3 %vm77_vm0, %v857_v60 }
 0x884   :  { %v890_v47 = vpop.f32.mrf.mxu3 }
 0x885   :  { %v891_v58 = vadd.f32 %v1162_v0, %v890_v47 }
 0x887   :  { %v897_v4 = vmul.f32 %v891_v58, %v891_v58  ;;  %v895_v21 = vmul.f32 0.5, %v891_v58 }
 0x889   :  { %v899_v6 = vmul.f32 %v897_v4, %v891_v58 }
 0x88b   :  { %v901_v7 = vmul.f32 0.044715, %v899_v6 }
 0x88c   :  { %v892_v8 = vpop.f32.mrf.mxu3 }
 0x88d   :  { %v903_v9 = vadd.f32 %v901_v7, %v891_v58  ;;  %v893_v16 = vadd.f32 %v1162_v0, %v892_v8 }
 0x88f   :  { %v898_v11 = vmul.f32 %v893_v16, %v893_v16  ;;  %v905_v12 = vmul.f32 0.7978846, %v903_v9  ;;  %v896_v28 = vmul.f32 0.5, %v893_v16 }
 0x891   :  { %v900_v13 = vmul.f32 %v898_v11, %v893_v16  ;;  %1214 = vtanh.f32 %v905_v12 }
 0x893   :  { %v902_v14 = vmul.f32 0.044715, %v900_v13 }
 0x895   :  { %v904_v20 = vadd.f32 %v902_v14, %v893_v16 }
 0x897   :  { %v906_v15 = vmul.f32 0.7978846, %v904_v20  ;;  %v1215_v17 = vpop.eup %1214 }
 0x898   :  { %v909_v18 = vadd.f32 1.0, %v1215_v17 }
 0x899   :  { %1216 = vtanh.f32 %v906_v15 }
 0x89a   :  { %v911_v23 = vmul.f32 %v909_v18, %v895_v21 }
 0x89f   :  { %v1217_v19 = vpop.eup %1216 }
 0x8a0   :  { %v910_v10 = vadd.f32 1.0, %v1217_v19 }
 0x8a2   :  { %v912_v24 = vmul.f32 %v910_v10, %v896_v28 }
 0x8a4   :  { %v913_v25 = vpack.c.bf16 %v912_v24, %v911_v23 }
 0x8a6   :  { %990 = vmatmul.bf16.vlgmr.msra.gmra.mxu0 %v913_v25 }
 0x923   :  { %v991_v29 = vpop.f32.mrf.mxu0 }
 0x924   :  { %v992_v2 = vadd.f32 %v1163_v27, %v991_v29 }
 0x926   :  { %v996_v31 = vadd.f32 %v992_v2, %v1558_v3 }
 0x928   :  { %998 = vst.msk [vmem:[#allocation2] sm:$0xff] %vm77_vm0, %v996_v31 }
 0x92b   :  { %v993_v32 = vpop.f32.mrf.mxu0 }
 0x92c   :  { %v994_v33 = vadd.f32 %v1163_v27, %v993_v32 }
 0x92e   :  { %v997_v34 = vadd.f32 %v994_v33, %v1563_v5 }
 0x930   :  { %999 = vst.msk [vmem:[#allocation2 + $0x8] sm:$0xff] %vm77_vm0, %v997_v34 }
 0x931   :  { %1012 = dma.vmem_to_hbm [thread:$0]  %s1005_s10, 256, %s1007_s23, [#allocation3], %s1256_s13, %s1256_s13, %s1252_s1  }
 0x932   :  { %1242 = dma.done.wait [#allocation3], 256  }
 0x933   :  { %1243 = vsyncadd [#allocation3], 4294967040 }
 0x934   :  { %1017 = vsyncpa [#allocation3], 1 }

</bundles_post_ra>
